<compile_context>
chip_gen: v5e
topology: v5e:2x2
jax: 0.10.0
libtpu: 0.0.40
codegen_flags: <defaults>
</compile_context>

<pallas_src>
import functools

import jax
import jax.numpy as jnp
from jax.experimental import pallas as pl
from jax.experimental.pallas import tpu as pltpu

_LANE = 128
_MAX_ROWS_PER_STEP = 2048    # cap on 128-lane rows per grid step
_MAX_C_PER_STEP = 256        # cap on channels reduced per grid step
_MIN_ROWS_TARGET = 64        # prefer at least this many rows before chunking C


def _round_up(v, m):
    return (v + m - 1) // m * m


def _vmem_capacity_bytes():
    """Generation-aware VMEM size (128 MiB v5e/v6e, 64 MiB per-TC v7x)."""
    try:
        cap = getattr(pltpu.get_tpu_info(), "vmem_capacity_bytes", None)
        if cap:
            return int(cap)
    except Exception:
        pass
    return 64 * 1024 * 1024  # conservative default (v7x per-TC VMEM)


def _channel_max_kernel(x_ref, o_ref, *, c_total, c_chunk, num_c_blocks):
    """x_ref: (c_chunk, r_tile, 128) VMEM block; o_ref: (r_tile, 128) (resident)."""
    # Channels [0, tail) are in-range for every channel block.
    tail = c_total - (num_c_blocks - 1) * c_chunk
    # Single leading-axis reduce: Mosaic keeps the running max in a vreg per
    # output tile (channel loop innermost) — no large loop carry through VMEM.
    m = jnp.max(x_ref[:tail], axis=0)
    if tail < c_chunk:
        # Remaining slabs are out of range only in the final channel block;
        # mask them dynamically (at most num_c_blocks - 1 slabs).
        base = pl.program_id(2) * c_chunk
        for c in range(tail, c_chunk):
            m = jnp.where(base + c < c_total, jnp.maximum(m, x_ref[c]), m)
    if num_c_blocks == 1:
        o_ref[...] = m
    else:
        c_blk = pl.program_id(2)

        @pl.when(c_blk == 0)
        def _init():
            o_ref[...] = m

        @pl.when(c_blk > 0)
        def _accumulate():
            o_ref[...] = jnp.maximum(o_ref[...], m)


def _choose_tiling(N, C, rows, itemsize, budget):
    """Pick (c_chunk, num_c, r_tile, num_r) against the VMEM working-set budget."""
    pack = max(8, 32 // itemsize)  # sublane packing: 8 f32, 16 bf16, 32 int8/fp8

    def rows_for(cc):
        # Double-buffered input block + output block per step.
        r = budget // (2 * (cc + 1) * _LANE * itemsize)
        return (r // pack) * pack

    rows_target = max(pack, min(_MIN_ROWS_TARGET, _round_up(rows, pack)))
    c_chunk = min(C, _MAX_C_PER_STEP)
    # Only chunk channels further when whole-C blocks would force tiny row tiles.
    while c_chunk > 1 and rows_for(c_chunk) < rows_target:
        c_chunk = (c_chunk + 1) // 2
    num_c = pl.cdiv(C, c_chunk)
    c_chunk = pl.cdiv(C, num_c)  # rebalance chunks -> masked remainder <= num_c-1

    r_tile = max(pack, min(rows_for(c_chunk), _MAX_ROWS_PER_STEP))
    if rows <= r_tile:
        r_tile = rows            # one full-extent block along rows (always legal)
    num_r = pl.cdiv(rows, r_tile)

    # v7x has 2 TensorCores sharded over the parallel grid axes: guarantee >= 2
    # grid steps whenever the problem allows it.
    if N * num_r * num_c < 2 and rows > pack:
        r_tile = max(pack, _round_up(pl.cdiv(rows, 2), pack))
        num_r = pl.cdiv(rows, r_tile)

    return c_chunk, num_c, r_tile, num_r


@jax.jit
def channel_max_pool(x):
    """torch.max(x, dim=1, keepdim=True)[0] for NCHW x."""
    N, C, H, W = x.shape
    S = H * W
    itemsize = jnp.dtype(x.dtype).itemsize

    rows = pl.cdiv(S, _LANE)
    s_pad = rows * _LANE

    vmem_cap = _vmem_capacity_bytes()
    budget = vmem_cap // 4       # working-set budget for double-buffered tiles
    vmem_limit = vmem_cap // 2   # scoped VMEM limit handed to Mosaic

    c_chunk, num_c, r_tile, num_r = _choose_tiling(N, C, rows, itemsize, budget)

    # Flatten spatial; pad only when S is not lane-aligned (reshape is free when
    # it is).  No padding to a multiple of the tile — partial edge blocks are
    # handled by the pipeline and never touch valid outputs.
    x2 = x.reshape(N, C, S)
    if s_pad != S:
        x2 = jnp.pad(x2, ((0, 0), (0, 0), (0, s_pad - S)))
    x3 = x2.reshape(N, C, rows, _LANE)

    kernel = functools.partial(
        _channel_max_kernel, c_total=C, c_chunk=c_chunk, num_c_blocks=num_c)

    out = pl.pallas_call(
        kernel,
        out_shape=jax.ShapeDtypeStruct((N, rows, _LANE), x.dtype),
        grid=(N, num_r, num_c),
        in_specs=[
            pl.BlockSpec((pl.Squeezed(), c_chunk, r_tile, _LANE),
                         lambda n, r, c: (n, c, r, 0)),
        ],
        out_specs=pl.BlockSpec((pl.Squeezed(), r_tile, _LANE),
                               lambda n, r, c: (n, r, 0)),
        compiler_params=pltpu.CompilerParams(
            dimension_semantics=("parallel", "parallel", "arbitrary"),
            vmem_limit_bytes=int(vmem_limit),
        ),
    )(x3)

    if s_pad != S:
        out = out.reshape(N, s_pad)[:, :S]
    return out.reshape(N, 1, H, W)


if __name__ == "__main__":
    key = jax.random.PRNGKey(0)

    # Primary shape implied by the module (small NCHW).
    x = jax.random.normal(key, (2, 4, 16, 16), dtype=jnp.float32)
    out = jax.block_until_ready(channel_max_pool(x))
    ref = jnp.max(x, axis=1, keepdims=True)
    assert out.shape == (2, 1, 16, 16), out.shape
    assert jnp.array_equal(out, ref), "mismatch vs reference (primary)"

    # Exercise the channel-grid axis + masked-remainder path (C > _MAX_C_PER_STEP).
    k1, k2 = jax.random.split(key)
    x_big_c = jax.random.normal(k1, (1, 301, 16, 16), dtype=jnp.float32)
    out_big_c = jax.block_until_ready(channel_max_pool(x_big_c))
    assert jnp.array_equal(out_big_c, jnp.max(x_big_c, axis=1, keepdims=True)), \
        "mismatch vs reference (large C)"

    # Exercise the non-lane-aligned spatial path (S % 128 != 0 -> minimal pad).
    x_odd = jax.random.normal(k2, (2, 3, 5, 7), dtype=jnp.float32)
    out_odd = jax.block_until_ready(channel_max_pool(x_odd))
    assert jnp.array_equal(out_odd, jnp.max(x_odd, axis=1, keepdims=True)), \
        "mismatch vs reference (padded spatial)"

    print("KERNEL_OK")
</pallas_src>

<mosaic_0001>
module attributes {stable_mosaic.version = 11 : i64} {
  func.func @_channel_max_kernel(%arg0: i32, %arg1: i32, %arg2: i32, %arg3: memref<1x4x2x128xf32, #tpu.memory_space<vmem>>, %arg4: memref<1x2x128xf32, #tpu.memory_space<vmem>>) attributes {dimension_semantics = [#tpu.dimension_semantics<parallel>, #tpu.dimension_semantics<parallel>, #tpu.dimension_semantics<arbitrary>], iteration_bounds = array<i64: 2, 1, 1>, scalar_prefetch = 0 : i64, scratch_operands = 0 : i64, tpu.core_type = #tpu.core_type<tc>, window_params = [{transform_indices = @transform_0, window_bounds = array<i64: 1, 4, 2, 128>}, {transform_indices = @transform_1, window_bounds = array<i64: 1, 2, 128>}]} {
    %c0 = arith.constant 0 : index
    %c0_0 = arith.constant 0 : index
    %c0_1 = arith.constant 0 : index
    %c0_2 = arith.constant 0 : index
    %0 = vector.load %arg3[%c0, %c0_0, %c0_1, %c0_2] : memref<1x4x2x128xf32, #tpu.memory_space<vmem>>, vector<1x4x2x128xf32>
    %1 = vector.shape_cast %0 : vector<1x4x2x128xf32> to vector<4x2x128xf32>
    %cst = arith.constant dense<0xFF800000> : vector<2x128xf32>
    %2 = vector.multi_reduction <maximumf>, %1, %cst [0] : vector<4x2x128xf32> to vector<2x128xf32>
    %c0_3 = arith.constant 0 : index
    %c0_4 = arith.constant 0 : index
    %c0_5 = arith.constant 0 : index
    %3 = vector.load %arg4[%c0_3, %c0_4, %c0_5] : memref<1x2x128xf32, #tpu.memory_space<vmem>>, vector<1x2x128xf32>
    %4 = vector.shape_cast %3 : vector<1x2x128xf32> to vector<2x128xf32>
    %5 = vector.shape_cast %2 : vector<2x128xf32> to vector<1x2x128xf32>
    tpu.vector_store %arg4[%c0_3, %c0_4, %c0_5], %5 {strides = array<i32>} : memref<1x2x128xf32, #tpu.memory_space<vmem>>, vector<1x2x128xf32>,
    return
  }
  func.func @transform_0(%arg0: i32, %arg1: i32, %arg2: i32) -> (i32, i32, i32, i32) {
    %c0_i32 = arith.constant 0 : i32
    %c0_i32_0 = arith.constant 0 : i32
    return %arg0, %arg2, %arg1, %c0_i32 : i32, i32, i32, i32
  }
  func.func @transform_1(%arg0: i32, %arg1: i32, %arg2: i32) -> (i32, i32, i32) {
    %c0_i32 = arith.constant 0 : i32
    %c0_i32_0 = arith.constant 0 : i32
    return %arg0, %arg1, %c0_i32 : i32, i32, i32
  }
}

</mosaic_0001>

<bundles_post_ra>
// kernel: channel_max_pool.1
= control target key start
LH: loop header
LB: loop body
LE: loop exit
PB: predicated region body
PF: predicated region fallthrough
CT: control target
= control target key end

     0   :  { %s334_s6 = smov 0   ;;  %s336_s7 = smov 0   ;;  %s364_s0 = inlined_call_operand.vmem [shape: f32[2,4,2,128], index: 0, kind: input, shape index: {}]   ;;  %s365_s1 = inlined_call_operand.vmem [shape: f32[2,2,128], index: 1, kind: output, shape index: {}]  }
   0x1   :  { %s338_s8 = smov 0  }
   0x2 LB: > { %s30_s9 = sadd.s32 1, %s318_s7  ;;  %p269_p0 = scmp.ge.s32.totalorder %s322_s8, 1  ;;  %s322_s8 = sphi %s338_s8, %s11_s8   ;;  %s318_s7 = sphi %s336_s7, %s367_s7   ;;  %s314_s6 = sphi %s334_s6, %s366_s6  }
   0x3   : > { %p32_p1 = scmp.ge.s32.totalorder %s30_s9, 2  ;;  %p120_p2 = scmp.lt.s32.totalorder %s322_s8, 3 }
   0x5   : > { %s369_s9 = smov (%p32_p1, %s30_s9), 0  ;;  %p121_p3 = pnand %p269_p0, %p120_p2 }
   0x6   : > { %p150_p4 = scmp.lt.s32.totalorder (!%p121_p3), %s314_s6, 1 }
   0x7   : > { %124 = sbr.rel (%p121_p3) target bundleno = 23 (0x17), region = 24 }
   0xc   : > { %s371_s6 = smov (!%p150_p4, %s314_s6), 1  ;;  %vm173_vm0 = vcmask 1041408  }
   0xd   : > { %s275_s10 = sshll.u32 %s371_s6, 3  ;;  %s272_s14 = sshll.u32 %s371_s6, 1 }
   0xe   : > { %s160_s13 = scalar_lea.vmem %s364_s0, %s275_s10  ;;  %s168_s17 = scalar_lea.vmem %s365_s1, %s272_s14 }
   0xf   : > { %v169_v0 = vld [vmem:[%s160_s13] sm:$0x3]  ;;  %v170_v1 = vld [vmem:[%s160_s13 + $0x2] sm:$0x3]  ;;  %v171_v2 = vld [vmem:[%s160_s13 + $0x4] sm:$0x3] }
  0x10   : > { %v172_v3 = vld [vmem:[%s160_s13 + $0x6] sm:$0x3]  ;;  %v174_v4 = vsel %vm173_vm0, %v169_v0, -inf  ;;  %v175_v5 = vsel %vm173_vm0, %v170_v1, -inf  ;;  %v176_v6 = vsel %vm173_vm0, %v171_v2, -inf }
  0x11   : > { %v177_v7 = vsel %vm173_vm0, %v172_v3, -inf  ;;  %v178_v8 = vmax.f32 %v174_v4, %v175_v5 }
  0x12   : > { %v179_v9 = vmax.f32 %v176_v6, %v177_v7 }
  0x14   : > { %v180_v10 = vmax.f32 %v178_v8, %v179_v9 }
  0x16   : > { %181 = vst [vmem:[%s168_s17] sm:$0x3] %v180_v10 }
  0x17 PF: > { %s11_s8 = sadd.s32 1, %s322_s8   ;;  %s366_s6 = smov %s318_s7 }
  0x18   : > { %p8_p5 = scmp.ge.s32.totalorder %s11_s8, 4   ;;  %s367_s7 = smov %s369_s9 }
  0x1a   :  { %10 = sbr.rel (!%p8_p5) target bundleno = 2 (0x2), region = 54 }

</bundles_post_ra>
